<compile_context>
chip_gen: v7x
topology: tpu7x:2x2x1
jax: 0.10.0
libtpu: 0.0.40
codegen_flags: <defaults>
</compile_context>

<pallas_src>
import functools

import jax
import jax.numpy as jnp
from jax.experimental import pallas as pl
from jax.experimental.pallas import tpu as pltpu


def _round_up(x, m):
    return ((x + m - 1) // m) * m


def _pick_tile_r(R, L, out_len, xp_len, itemsize, sublane, budget_bytes):
    """Row-tile size: as large as the VMEM budget allows, counting both the
    double-buffered in/out tiles and the in-kernel f32 temporaries."""
    per_row = 2 * itemsize * (L + out_len)          # pipelined in + out buffers
    per_row += 4 * (L + 2 * xp_len + out_len)       # f32 temporaries in-kernel
    t = budget_bytes // max(per_row, 1)
    if R >= 2 * sublane:
        # Keep at least 2 grid steps so both v7x TensorCores get work under
        # dimension_semantics=("parallel",).  No-op on tiny problems.
        t = min(t, _round_up(-(-R // 2), sublane))
    if t >= R:
        return R                                    # block == full dim (exempt)
    return max(sublane, (t // sublane) * sublane)


def _moving_avg_tree_kernel(x_ref, o_ref, *, kernel_size, pad, seq_len, out_len):
    """stride == 1 path.

    x_ref: (TR, L) rows of the *unpadded* series.
    o_ref: (TR, out_len) moving average (true length, tail store is masked).

    Replicate padding is built in-registers once; the k-wide sliding-window
    sum is a doubling tree: partial sums of widths 1,2,4,... are built with
    one shifted add each, then the set bits of k are combined.
    """
    x = x_ref[...].astype(jnp.float32)              # (TR, L)
    tr = x.shape[0]
    xp_len = seq_len + 2 * pad

    if pad > 0:
        xp = jnp.concatenate(
            [jnp.broadcast_to(x[:, 0:1], (tr, pad)),
             x,
             jnp.broadcast_to(x[:, seq_len - 1:seq_len], (tr, pad))],
            axis=-1)
    else:
        xp = x

    # Doubling-tree sliding-window sum of width kernel_size.
    s = xp                      # width-1 window sums, length xp_len
    s_len = xp_len
    width = 1
    covered = 0
    rem = kernel_size
    acc = None
    while True:
        if rem & 1:
            piece = s[:, covered:covered + out_len]
            acc = piece if acc is None else acc + piece
            covered += width
        rem >>= 1
        if rem == 0:
            break
        s = s[:, :s_len - width] + s[:, width:s_len]   # width -> 2*width
        s_len -= width
        width *= 2

    o_ref[...] = (acc * (1.0 / kernel_size)).astype(o_ref.dtype)


def _moving_avg_matmul_kernel(x_ref, w_ref, o_ref):
    """stride > 1 fallback: compact folded weight matrix on the MXU.
    Replicate padding and 1/k are folded into W; W is grid-invariant."""
    o_ref[...] = jnp.dot(
        x_ref[...].astype(jnp.float32), w_ref[...],
        preferred_element_type=jnp.float32).astype(o_ref.dtype)


def moving_avg_forward(x, kernel_size, stride):
    """x: (B, C, L) -> (B, C, out_len), matching the PyTorch module."""
    B, C, L = x.shape
    pad = (kernel_size - 1) // 2
    xp_len = L + 2 * pad
    out_len = (xp_len - kernel_size) // stride + 1
    R = B * C
    x2 = x.reshape(R, L)

    itemsize = jnp.dtype(x.dtype).itemsize
    sublane = 8 * max(1, 4 // itemsize)             # 8 f32 / 16 bf16 / 32 int8

    # Generation-aware VMEM budgets (v5e/v6e: 128 MiB phys, v7x: 64 MiB).
    vmem_phys = 64 * 1024 * 1024                    # conservative fallback (v7x)
    try:
        info = pltpu.get_tpu_info()
        vmem_phys = int(getattr(info, "vmem_capacity_bytes", vmem_phys)) or vmem_phys
    except Exception:
        pass
    vmem_limit = int(min(vmem_phys // 2, 64 * 1024 * 1024))
    tile_budget = vmem_limit // 2
    if stride != 1:
        tile_budget = max(1 << 20, tile_budget - 2 * L * out_len * 4)  # resident W

    tile_r = _pick_tile_r(R, L, out_len, xp_len, itemsize, sublane, tile_budget)
    grid = (pl.cdiv(R, tile_r),)
    out_shape = jax.ShapeDtypeStruct((R, out_len), x.dtype)
    x_spec = pl.BlockSpec((tile_r, L), lambda i: (i, 0))
    o_spec = pl.BlockSpec((tile_r, out_len), lambda i: (i, 0))
    cparams = pltpu.CompilerParams(
        dimension_semantics=("parallel",),
        vmem_limit_bytes=vmem_limit,
    )

    if stride == 1:
        n_adds = kernel_size.bit_length() + bin(kernel_size).count("1")
        cost = pl.CostEstimate(
            flops=int(R * out_len * n_adds),
            transcendentals=0,
            bytes_accessed=int(R * (L + out_len) * itemsize),
        )
        out = pl.pallas_call(
            functools.partial(
                _moving_avg_tree_kernel,
                kernel_size=kernel_size, pad=pad, seq_len=L, out_len=out_len),
            out_shape=out_shape,
            grid=grid,
            in_specs=[x_spec],
            out_specs=o_spec,
            compiler_params=cparams,
            cost_estimate=cost,
        )(x2)
    else:
        # Folded weight: W[i, t] = #{ j in [0,k) : clip(t*s - pad + j, 0, L-1) == i } / k
        # (replicate padding and the 1/k average are both folded in).
        ii = jnp.arange(L)[:, None, None]
        tt = jnp.arange(out_len)[None, :, None]
        jj = jnp.arange(kernel_size)[None, None, :]
        src = jnp.clip(tt * stride - pad + jj, 0, L - 1)
        W = (src == ii).sum(axis=-1).astype(jnp.float32) * (1.0 / kernel_size)

        cost = pl.CostEstimate(
            flops=int(2 * R * L * out_len),
            transcendentals=0,
            bytes_accessed=int(R * (L + out_len) * itemsize + L * out_len * 4),
        )
        out = pl.pallas_call(
            _moving_avg_matmul_kernel,
            out_shape=out_shape,
            grid=grid,
            in_specs=[
                x_spec,
                # grid-invariant block -> DMA'd once, stays resident in VMEM
                pl.BlockSpec((L, out_len), lambda i: (0, 0)),
            ],
            out_specs=o_spec,
            compiler_params=cparams,
            cost_estimate=cost,
        )(x2, W)

    return out.reshape(B, C, out_len)


def _reference(x, kernel_size, stride):
    """Pure-JAX reference mirroring the PyTorch forward."""
    pad = (kernel_size - 1) // 2
    front = jnp.repeat(x[:, :, 0:1], pad, axis=-1)
    end = jnp.repeat(x[:, :, -1:], pad, axis=-1)
    xp = jnp.concatenate([front, x, end], axis=-1)
    L_pad = xp.shape[-1]
    out_len = (L_pad - kernel_size) // stride + 1
    cols = []
    for t in range(out_len):
        cols.append(jnp.mean(xp[:, :, t * stride:t * stride + kernel_size],
                             axis=-1, keepdims=True))
    return jnp.concatenate(cols, axis=-1)


if __name__ == "__main__":
    B, C, L = 2, 4, 16
    key = jax.random.PRNGKey(0)
    x = jax.random.normal(key, (B, C, L), dtype=jnp.float32)

    # stride == 1, odd kernel (PatchMLP series_decomp usage): doubling-tree path.
    out1 = jax.block_until_ready(moving_avg_forward(x, kernel_size=5, stride=1))
    ref1 = _reference(x, 5, 1)
    assert out1.shape == ref1.shape, (out1.shape, ref1.shape)
    assert jnp.allclose(out1, ref1, atol=1e-5, rtol=1e-5), "k=5 s=1 mismatch"

    # stride == 1, large kernel (exercises replicate padding + deep tree).
    out2 = jax.block_until_ready(moving_avg_forward(x, kernel_size=25, stride=1))
    ref2 = _reference(x, 25, 1)
    assert out2.shape == ref2.shape, (out2.shape, ref2.shape)
    assert jnp.allclose(out2, ref2, atol=1e-5, rtol=1e-5), "k=25 s=1 mismatch"

    # stride > 1 with even kernel: compact folded-W MXU fallback path.
    out3 = jax.block_until_ready(moving_avg_forward(x, kernel_size=4, stride=2))
    ref3 = _reference(x, 4, 2)
    assert out3.shape == ref3.shape, (out3.shape, ref3.shape)
    assert jnp.allclose(out3, ref3, atol=1e-5, rtol=1e-5), "k=4 s=2 mismatch"

    print("KERNEL_OK")
</pallas_src>

<mosaic_0001>
module attributes {stable_mosaic.version = 11 : i64} {
  func.func @_moving_avg_tree_kernel(%arg0: i32, %arg1: memref<8x16xf32, #tpu.memory_space<vmem>>, %arg2: memref<8x16xf32, #tpu.memory_space<vmem>>) attributes {dimension_semantics = [#tpu.dimension_semantics<parallel>], iteration_bounds = array<i64: 1>, scalar_prefetch = 0 : i64, scratch_operands = 0 : i64, tpu.core_type = #tpu.core_type<tc>, window_params = [{transform_indices = @transform_0, window_bounds = array<i64: 8, 16>}, {transform_indices = @transform_1, window_bounds = array<i64: 8, 16>}]} {
    %c0 = arith.constant 0 : index
    %c0_0 = arith.constant 0 : index
    %0 = vector.load %arg1[%c0, %c0_0] : memref<8x16xf32, #tpu.memory_space<vmem>>, vector<8x16xf32>
    %1 = vector.extract_strided_slice %0 {offsets = [0, 0], sizes = [8, 1], strides = [1, 1]} : vector<8x16xf32> to vector<8x1xf32>
    %2 = vector.shape_cast %1 : vector<8x1xf32> to vector<8x1xf32>
    %3 = vector.broadcast %2 : vector<8x1xf32> to vector<8x2xf32>
    %4 = vector.extract_strided_slice %0 {offsets = [0, 15], sizes = [8, 1], strides = [1, 1]} : vector<8x16xf32> to vector<8x1xf32>
    %5 = vector.shape_cast %4 : vector<8x1xf32> to vector<8x1xf32>
    %6 = vector.broadcast %5 : vector<8x1xf32> to vector<8x2xf32>
    %7 = tpu.concatenate %3, %0, %6 in 1 : vector<8x2xf32>, vector<8x16xf32>, vector<8x2xf32> -> vector<8x20xf32>
    %8 = vector.extract_strided_slice %7 {offsets = [0, 0], sizes = [8, 16], strides = [1, 1]} : vector<8x20xf32> to vector<8x16xf32>
    %9 = vector.extract_strided_slice %7 {offsets = [0, 0], sizes = [8, 19], strides = [1, 1]} : vector<8x20xf32> to vector<8x19xf32>
    %10 = vector.extract_strided_slice %7 {offsets = [0, 1], sizes = [8, 19], strides = [1, 1]} : vector<8x20xf32> to vector<8x19xf32>
    %11 = arith.addf %9, %10 : vector<8x19xf32>
    %12 = vector.extract_strided_slice %11 {offsets = [0, 0], sizes = [8, 17], strides = [1, 1]} : vector<8x19xf32> to vector<8x17xf32>
    %13 = vector.extract_strided_slice %11 {offsets = [0, 2], sizes = [8, 17], strides = [1, 1]} : vector<8x19xf32> to vector<8x17xf32>
    %14 = arith.addf %12, %13 : vector<8x17xf32>
    %15 = vector.extract_strided_slice %14 {offsets = [0, 1], sizes = [8, 16], strides = [1, 1]} : vector<8x17xf32> to vector<8x16xf32>
    %16 = arith.addf %8, %15 : vector<8x16xf32>
    %cst = arith.constant 2.000000e-01 : f32
    %17 = vector.broadcast %cst : f32 to vector<8x16xf32>
    %18 = arith.mulf %16, %17 : vector<8x16xf32>
    %c0_1 = arith.constant 0 : index
    %c0_2 = arith.constant 0 : index
    %19 = vector.load %arg2[%c0_1, %c0_2] : memref<8x16xf32, #tpu.memory_space<vmem>>, vector<8x16xf32>
    tpu.vector_store %arg2[%c0_1, %c0_2], %18 {strides = array<i32>} : memref<8x16xf32, #tpu.memory_space<vmem>>, vector<8x16xf32>,
    return
  }
  func.func @transform_0(%arg0: i32) -> (i32, i32) {
    %c0_i32 = arith.constant 0 : i32
    %c0_i32_0 = arith.constant 0 : i32
    return %arg0, %c0_i32 : i32, i32
  }
  func.func @transform_1(%arg0: i32) -> (i32, i32) {
    %c0_i32 = arith.constant 0 : i32
    %c0_i32_0 = arith.constant 0 : i32
    return %arg0, %c0_i32 : i32, i32
  }
}

</mosaic_0001>

<bundles_post_ra>
// kernel: tpu_custom_call.1
= control target key start
LH: loop header
LB: loop body
LE: loop exit
PB: predicated region body
PF: predicated region fallthrough
CT: control target
= control target key end

     0   :  { %6 = vsyncpa [#allocation3], 0  ;;  %s169_s0 = inlined_call_operand.hbm [shape: f32[8,16], index: 0, kind: input, shape index: {}]   ;;  %s170_s1 = inlined_call_operand.hbm [shape: f32[8,16], index: 1, kind: output, shape index: {}]  }
   0x1   :  { %7 = vsyncpa [#allocation4], 0  ;;  %s128_s6 = smov [#allocation2]   ;;  %s80_s10 = scalar_lea.hbm %s169_s0, 128 }
   0x2   :  { %s14_s7 = sshll.u32 %s128_s6, 4  ;;  %p81_p0 = scmp.ne.s32.totalorder %s169_s0, %s80_s10  ;;  %s15_s7 = int_to_ptr.vmem [resolvable:$true] %s14_s7 }
   0x3   :  { %p84_p1 = scmp.lt.u32.totalorder %s80_s10, %s169_s0 }
   0x5   :  { %p86_p2 = pnand %p84_p1, %p81_p0 }
   0x7   :  { %89 = shalt.err (!%p86_p2)
}
   0x8   :  { %s90_s15 = scalar_lea.vmem %s15_s7, 128  ;;  %p95_p4 = scmp.lt.s32.totalorder %s15_s7, %s15_s7 }
   0x9   :  { %p91_p3 = scmp.ne.s32.totalorder %s15_s7, %s90_s15  ;;  %p96_p5 = scmp.lt.s32.totalorder %s90_s15, %s90_s15 }
   0xb   :  { %p97_p6 = por %p96_p5, %p95_p4 }
   0xd   :  { %p98_p7 = pnand %p97_p6, %p91_p3 }
   0xf   :  { %101 = shalt.err (!%p98_p7)
}
  0x10   :  { %17 = dma.hbm_to_vmem [thread:$0]  %s169_s0, 128, %s15_s7, [#allocation3]  }
  0x11   :  { %124 = dma.done.wait [#allocation3], 128  }
  0x12   :  { %125 = vsyncadd [#allocation3], 4294967168  ;;  %v129_v0 = vmov 0   ;;  %v21_v1 = vld [vmem:[#allocation2] sm:$0xff]  ;;  %s130_s18 = smov 2   ;;  %v131_v2 = vmov 15  }
  0x13   :  { %78 = vset.pattern.permute.xlu0 %v129_v0  ;;  %31 = vrot.lane.b32.xlu1 %v21_v1, %s130_s18  ;;  %vm34_vm0 = vcmask 15360   ;;  %vm36_vm1 = vcmask 146432   ;;  %s132_s19 = smov 127   ;;  %s133_s0 = smov 126   ;;  %vm54_vm2 = vcmask 130048  }
  0x14   :  { %24 = vperm.xlu0 %78, %v21_v1   ;;  %s134_s20 = smov [#allocation5]  }
  0x15   :  { %s62_s21 = sshll.u32 %s134_s20, 4  ;;  %s63_s21 = int_to_ptr.vmem [resolvable:$true] %s62_s21 }
  0x16   :  { %s102_s22 = scalar_lea.vmem %s63_s21, 128  ;;  %p107_p9 = scmp.lt.s32.totalorder %s63_s21, %s63_s21 }
  0x17   :  { %p103_p8 = scmp.ne.s32.totalorder %s63_s21, %s102_s22  ;;  %p108_p10 = scmp.lt.s32.totalorder %s102_s22, %s102_s22 }
  0x18   :  { %79 = vset.pattern.permute.xlu0 %v131_v2 }
  0x19   :  { %28 = vperm.xlu0 %79, %v21_v1   ;;  %p109_p11 = por %p108_p10, %p107_p9 }
  0x1b   :  { %p110_p12 = pnand %p109_p11, %p103_p8 }
  0x85   :  { %v32_v4 = vpop.permute.xlu1 %31 }
  0x93   :  { %v25_v3 = vpop.permute.xlu0 %24 }
  0x94   :  { %v35_v5 = vsel %vm34_vm0, %v25_v3, %v32_v4 }
  0x98   :  { %v29_v6 = vpop.permute.xlu0 %28 }
  0x99   :  { %v37_v7 = vsel %vm36_vm1, %v35_v5, %v29_v6 }
  0x9a   :  { %39 = vrot.lane.b32.xlu1 %v37_v7, %s132_s19 }
 0x10c   :  { %v40_v8 = vpop.permute.xlu1 %39 }
 0x10d   :  { %v42_v9 = vadd.f32 %v40_v8, %v37_v7 }
 0x10f   :  { %44 = vrot.lane.b32.xlu1 %v42_v9, %s133_s0 }
 0x181   :  { %v45_v10 = vpop.permute.xlu1 %44 }
 0x182   :  { %v47_v11 = vadd.f32 %v45_v10, %v42_v9 }
 0x184   :  { %49 = vrot.lane.b32.xlu0 %v47_v11, %s132_s19 }
 0x1f6   :  { %v50_v12 = vpop.permute.xlu0 %49 }
 0x1f7   :  { %v52_v13 = vadd.f32 %v50_v12, %v37_v7 }
 0x1f9   :  { %v53_v14 = vmul.f32 0.2, %v52_v13 }
 0x1fb   :  { %55 = vst.msk [vmem:[#allocation5] sm:$0xff] %vm54_vm2, %v53_v14 }
 0x1fc   :  { %113 = shalt.err (!%p110_p12)
}
 0x1fd   :  { %s114_s25 = scalar_lea.hbm %s170_s1, 128 }
 0x1fe   :  { %p115_p13 = scmp.ne.s32.totalorder %s170_s1, %s114_s25  ;;  %p118_p0 = scmp.lt.u32.totalorder %s114_s25, %s170_s1 }
 0x200   :  { %p120_p1 = pnand %p118_p0, %p115_p13 }
 0x202   :  { %123 = shalt.err (!%p120_p1)
}
 0x203   :  { %65 = dma.vmem_to_hbm [thread:$0]  %s63_s21, 128, %s170_s1, [#allocation4]  }
 0x204   :  { %126 = dma.done.wait [#allocation4], 128  }
 0x205   :  { %127 = vsyncadd [#allocation4], 4294967168 }
 0x206   :  { %69 = vsyncpa [#allocation3], 1 }
 0x207   :  { %70 = vsyncpa [#allocation4], 1 }

</bundles_post_ra>
